<compile_context>
chip_gen: v7x
topology: tpu7x:2x2x1
jax: 0.10.0
libtpu: 0.0.40
codegen_flags: <defaults>
</compile_context>

<pallas_src>
import jax
import jax.numpy as jnp
from jax.experimental import pallas as pl
from jax.experimental.pallas import tpu as pltpu


def _round_up(x, m):
    return (x + m - 1) // m * m


def actor_kernel(x_ref, w1_ref, b1_ref, w2_ref, b2_ref, w3_ref, b3_ref, o_ref):
    # x_ref: [state_size, TB]; weights [out, in]; biases [out, 1] (f32).
    # /9 is already folded into w1; all matmuls accumulate in f32 on the MXU.
    x = x_ref[...].astype(w1_ref.dtype)

    h1 = jnp.dot(w1_ref[...], x, preferred_element_type=jnp.float32) + b1_ref[...]
    h1 = jnp.maximum(h1, 0.0).astype(w2_ref.dtype)

    h2 = jnp.dot(w2_ref[...], h1, preferred_element_type=jnp.float32) + b2_ref[...]
    h2 = jnp.maximum(h2, 0.0).astype(w3_ref.dtype)

    h3 = jnp.dot(w3_ref[...], h2, preferred_element_type=jnp.float32) + b3_ref[...]
    o_ref[...] = jnp.tanh(h3).astype(o_ref.dtype)


def prepare_params(params, compute_dtype=jnp.float32):
    """One-time prep: fold 'state/9' into w1, keep the PyTorch [out, in] weight
    layout, reshape biases to [out, 1] (lane-broadcast columns), and cast the
    weights to the MXU compute dtype (jnp.bfloat16 for large batches)."""
    def col(b):
        return jnp.asarray(b, jnp.float32).reshape(-1, 1)

    return {
        "w1": (params["w1"] * (1.0 / 9.0)).astype(compute_dtype),
        "b1": col(params["b1"]),
        "w2": params["w2"].astype(compute_dtype),
        "b2": col(params["b2"]),
        "w3": params["w3"].astype(compute_dtype),
        "b3": col(params["b3"]),
    }


def _choose_batch_tile(B, block_batch):
    # Batch rides the 128-lane axis: the tile must be a multiple of 128 or == B.
    if B <= 128:
        return B
    tb = min(block_batch, _round_up(B, 128))
    # Aim for >= 2 grid steps so ("parallel",) can use both TensorCores on v7x.
    half = _round_up(pl.cdiv(B, 2), 128)
    return max(128, min(tb, half))


def actor_forward_t(state_t, prepared, *, block_batch=1024):
    """Lane-dense entry point: state_t is [state_size, B] -> [action_size, B]."""
    state_size, B = state_t.shape
    action_size = prepared["w3"].shape[0]

    tb = _choose_batch_tile(B, block_batch)
    grid = (pl.cdiv(B, tb),)

    def resident(arr):
        # Whole array as one block, same block every grid step -> stays in VMEM.
        return pl.BlockSpec(arr.shape, lambda i: (0, 0))

    return pl.pallas_call(
        actor_kernel,
        out_shape=jax.ShapeDtypeStruct((action_size, B), jnp.float32),
        grid=grid,
        in_specs=[
            pl.BlockSpec((state_size, tb), lambda i: (0, i)),  # activation tile
            resident(prepared["w1"]),
            resident(prepared["b1"]),
            resident(prepared["w2"]),
            resident(prepared["b2"]),
            resident(prepared["w3"]),
            resident(prepared["b3"]),
        ],
        out_specs=pl.BlockSpec((action_size, tb), lambda i: (0, i)),
        compiler_params=pltpu.CompilerParams(
            dimension_semantics=("parallel",),
        ),
    )(
        state_t,
        prepared["w1"], prepared["b1"],
        prepared["w2"], prepared["b2"],
        prepared["w3"], prepared["b3"],
    )


def actor_forward(state, prepared, *, block_batch=1024):
    """Drop-in forward matching the PyTorch module: [B, state_size] -> [B, action_size].

    The boundary transposes are layout plumbing that keep the kernel lane-dense;
    callers that can keep activations in [features, batch] layout should call
    actor_forward_t directly and skip them.  The input is cast to the weight
    compute dtype here so bf16 prepared params put bf16 on the wire (HBM DMA)."""
    x_t = state.T.astype(prepared["w1"].dtype)
    out_t = actor_forward_t(x_t, prepared, block_batch=block_batch)
    return out_t.T


def init_params(key, state_size, action_size, fc1_units=128, fc2_units=64):
    """Deterministic init mimicking nn.Linear default U(-1/sqrt(fan_in), 1/sqrt(fan_in)).
    Weights are stored PyTorch-style as [out_features, in_features]."""
    def linear(k, fan_in, fan_out):
        kw, kb = jax.random.split(k)
        bound = 1.0 / jnp.sqrt(fan_in)
        w = jax.random.uniform(kw, (fan_out, fan_in), jnp.float32, -bound, bound)
        b = jax.random.uniform(kb, (fan_out,), jnp.float32, -bound, bound)
        return w, b

    k1, k2, k3 = jax.random.split(key, 3)
    w1, b1 = linear(k1, state_size, fc1_units)
    w2, b2 = linear(k2, fc1_units, fc2_units)
    w3, b3 = linear(k3, fc2_units, action_size)
    return {"w1": w1, "b1": b1, "w2": w2, "b2": b2, "w3": w3, "b3": b3}


def actor_ref(state, params):
    """Pure-JAX reference (original, un-folded [out, in] params)."""
    x = state / 9.0
    x = jnp.maximum(x @ params["w1"].T + params["b1"], 0.0)
    x = jnp.maximum(x @ params["w2"].T + params["b2"], 0.0)
    return jnp.tanh(x @ params["w3"].T + params["b3"])


if __name__ == "__main__":
    key = jax.random.PRNGKey(0)
    k_state, k_params = jax.random.split(key)

    state_size = 32
    action_size = 8
    params = init_params(k_params, state_size, action_size)
    prepared = prepare_params(params)  # f32 compute; pass jnp.bfloat16 for big batches

    # Small single-tile case (grid=(1,), batch == lane tile).
    batch = 8
    state = jax.random.normal(k_state, (batch, state_size), jnp.float32) * 9.0
    out = jax.block_until_ready(actor_forward(state, prepared))
    ref = actor_ref(state, params)
    assert out.shape == (batch, action_size), out.shape
    assert jnp.allclose(out, ref, atol=1e-5, rtol=1e-5), "mismatch (small batch)"

    # Multi-tile case: grid=(2,) with a partial (masked) final lane tile.
    batch2 = 300
    state2 = jax.random.normal(k_state, (batch2, state_size), jnp.float32) * 9.0
    out2 = jax.block_until_ready(actor_forward(state2, prepared))
    ref2 = actor_ref(state2, params)
    assert out2.shape == (batch2, action_size), out2.shape
    assert jnp.allclose(out2, ref2, atol=1e-5, rtol=1e-5), "mismatch (multi-tile)"

    print("KERNEL_OK")
</pallas_src>

<mosaic_0001>
module attributes {stable_mosaic.version = 11 : i64} {
  func.func @actor_kernel(%arg0: i32, %arg1: memref<32x8xf32, #tpu.memory_space<vmem>>, %arg2: memref<128x32xf32, #tpu.memory_space<vmem>>, %arg3: memref<128x1xf32, #tpu.memory_space<vmem>>, %arg4: memref<64x128xf32, #tpu.memory_space<vmem>>, %arg5: memref<64x1xf32, #tpu.memory_space<vmem>>, %arg6: memref<8x64xf32, #tpu.memory_space<vmem>>, %arg7: memref<8x1xf32, #tpu.memory_space<vmem>>, %arg8: memref<8x8xf32, #tpu.memory_space<vmem>>) attributes {dimension_semantics = [#tpu.dimension_semantics<parallel>], iteration_bounds = array<i64: 1>, scalar_prefetch = 0 : i64, scratch_operands = 0 : i64, tpu.core_type = #tpu.core_type<tc>, window_params = [{transform_indices = @transform_0, window_bounds = array<i64: 32, 8>}, {pipeline_mode = #tpu.pipeline_mode<synchronous>, transform_indices = @transform_1, window_bounds = array<i64: 128, 32>}, {pipeline_mode = #tpu.pipeline_mode<synchronous>, transform_indices = @transform_2, window_bounds = array<i64: 128, 1>}, {pipeline_mode = #tpu.pipeline_mode<synchronous>, transform_indices = @transform_3, window_bounds = array<i64: 64, 128>}, {pipeline_mode = #tpu.pipeline_mode<synchronous>, transform_indices = @transform_4, window_bounds = array<i64: 64, 1>}, {pipeline_mode = #tpu.pipeline_mode<synchronous>, transform_indices = @transform_5, window_bounds = array<i64: 8, 64>}, {pipeline_mode = #tpu.pipeline_mode<synchronous>, transform_indices = @transform_6, window_bounds = array<i64: 8, 1>}, {transform_indices = @transform_7, window_bounds = array<i64: 8, 8>}]} {
    %c0 = arith.constant 0 : index
    %c0_0 = arith.constant 0 : index
    %0 = vector.load %arg1[%c0, %c0_0] : memref<32x8xf32, #tpu.memory_space<vmem>>, vector<32x8xf32>
    %c0_1 = arith.constant 0 : index
    %c0_2 = arith.constant 0 : index
    %1 = vector.load %arg2[%c0_1, %c0_2] : memref<128x32xf32, #tpu.memory_space<vmem>>, vector<128x32xf32>
    %cst = arith.constant dense<0.000000e+00> : vector<128x8xf32>
    %2 = tpu.matmul %1, %0, %cst {dimension_numbers = #tpu.dot_dimension_numbers<[1], [0], [0], [1], [0, 0, 1, 1], [], []>} : vector<128x32xf32>, vector<32x8xf32>, vector<128x8xf32> -> vector<128x8xf32>
    %c0_3 = arith.constant 0 : index
    %c0_4 = arith.constant 0 : index
    %3 = vector.load %arg3[%c0_3, %c0_4] : memref<128x1xf32, #tpu.memory_space<vmem>>, vector<128x1xf32>
    %4 = vector.broadcast %3 : vector<128x1xf32> to vector<128x8xf32>
    %5 = arith.addf %2, %4 : vector<128x8xf32>
    %cst_5 = arith.constant 0.000000e+00 : f32
    %6 = vector.broadcast %cst_5 : f32 to vector<128x8xf32>
    %7 = arith.maximumf %5, %6 : vector<128x8xf32>
    %c0_6 = arith.constant 0 : index
    %c0_7 = arith.constant 0 : index
    %8 = vector.load %arg4[%c0_6, %c0_7] : memref<64x128xf32, #tpu.memory_space<vmem>>, vector<64x128xf32>
    %cst_8 = arith.constant dense<0.000000e+00> : vector<64x8xf32>
    %9 = tpu.matmul %8, %7, %cst_8 {dimension_numbers = #tpu.dot_dimension_numbers<[1], [0], [0], [1], [0, 0, 1, 1], [], []>} : vector<64x128xf32>, vector<128x8xf32>, vector<64x8xf32> -> vector<64x8xf32>
    %c0_9 = arith.constant 0 : index
    %c0_10 = arith.constant 0 : index
    %10 = vector.load %arg5[%c0_9, %c0_10] : memref<64x1xf32, #tpu.memory_space<vmem>>, vector<64x1xf32>
    %11 = vector.broadcast %10 : vector<64x1xf32> to vector<64x8xf32>
    %12 = arith.addf %9, %11 : vector<64x8xf32>
    %cst_11 = arith.constant 0.000000e+00 : f32
    %13 = vector.broadcast %cst_11 : f32 to vector<64x8xf32>
    %14 = arith.maximumf %12, %13 : vector<64x8xf32>
    %c0_12 = arith.constant 0 : index
    %c0_13 = arith.constant 0 : index
    %15 = vector.load %arg6[%c0_12, %c0_13] : memref<8x64xf32, #tpu.memory_space<vmem>>, vector<8x64xf32>
    %cst_14 = arith.constant dense<0.000000e+00> : vector<8x8xf32>
    %16 = tpu.matmul %15, %14, %cst_14 {dimension_numbers = #tpu.dot_dimension_numbers<[1], [0], [0], [1], [0, 0, 1, 1], [], []>} : vector<8x64xf32>, vector<64x8xf32>, vector<8x8xf32> -> vector<8x8xf32>
    %c0_15 = arith.constant 0 : index
    %c0_16 = arith.constant 0 : index
    %17 = vector.load %arg7[%c0_15, %c0_16] : memref<8x1xf32, #tpu.memory_space<vmem>>, vector<8x1xf32>
    %18 = vector.broadcast %17 : vector<8x1xf32> to vector<8x8xf32>
    %19 = arith.addf %16, %18 : vector<8x8xf32>
    %20 = math.tanh %19 : vector<8x8xf32>
    %c0_17 = arith.constant 0 : index
    %c0_18 = arith.constant 0 : index
    %21 = vector.load %arg8[%c0_17, %c0_18] : memref<8x8xf32, #tpu.memory_space<vmem>>, vector<8x8xf32>
    tpu.vector_store %arg8[%c0_17, %c0_18], %20 {strides = array<i32>} : memref<8x8xf32, #tpu.memory_space<vmem>>, vector<8x8xf32>,
    return
  }
  func.func @transform_0(%arg0: i32) -> (i32, i32) {
    %c0_i32 = arith.constant 0 : i32
    %c0_i32_0 = arith.constant 0 : i32
    return %c0_i32, %arg0 : i32, i32
  }
  func.func @transform_1(%arg0: i32) -> (i32, i32) {
    %c0_i32 = arith.constant 0 : i32
    %c0_i32_0 = arith.constant 0 : i32
    %c0_i32_1 = arith.constant 0 : i32
    return %c0_i32, %c0_i32_0 : i32, i32
  }
  func.func @transform_2(%arg0: i32) -> (i32, i32) {
    %c0_i32 = arith.constant 0 : i32
    %c0_i32_0 = arith.constant 0 : i32
    %c0_i32_1 = arith.constant 0 : i32
    return %c0_i32, %c0_i32_0 : i32, i32
  }
  func.func @transform_3(%arg0: i32) -> (i32, i32) {
    %c0_i32 = arith.constant 0 : i32
    %c0_i32_0 = arith.constant 0 : i32
    %c0_i32_1 = arith.constant 0 : i32
    return %c0_i32, %c0_i32_0 : i32, i32
  }
  func.func @transform_4(%arg0: i32) -> (i32, i32) {
    %c0_i32 = arith.constant 0 : i32
    %c0_i32_0 = arith.constant 0 : i32
    %c0_i32_1 = arith.constant 0 : i32
    return %c0_i32, %c0_i32_0 : i32, i32
  }
  func.func @transform_5(%arg0: i32) -> (i32, i32) {
    %c0_i32 = arith.constant 0 : i32
    %c0_i32_0 = arith.constant 0 : i32
    %c0_i32_1 = arith.constant 0 : i32
    return %c0_i32, %c0_i32_0 : i32, i32
  }
  func.func @transform_6(%arg0: i32) -> (i32, i32) {
    %c0_i32 = arith.constant 0 : i32
    %c0_i32_0 = arith.constant 0 : i32
    %c0_i32_1 = arith.constant 0 : i32
    return %c0_i32, %c0_i32_0 : i32, i32
  }
  func.func @transform_7(%arg0: i32) -> (i32, i32) {
    %c0_i32 = arith.constant 0 : i32
    %c0_i32_0 = arith.constant 0 : i32
    return %c0_i32, %arg0 : i32, i32
  }
}

</mosaic_0001>

<bundles_post_ra>
// kernel: tpu_custom_call.1
= control target key start
LH: loop header
LB: loop body
LE: loop exit
PB: predicated region body
PF: predicated region fallthrough
CT: control target
= control target key end

     0   :  { %vm143_vm0 = vcmask 261120   ;;  %v870_v6 = vmov 0   ;;  %s1105_s0 = inlined_call_operand.vmem [shape: f32[32,8], index: 0, kind: input, shape index: {}]   ;;  %s1106_s1 = inlined_call_operand.vmem [shape: f32[128,32], index: 1, kind: input, shape index: {}]   ;;  %s1107_s2 = inlined_call_operand.vmem [shape: f32[128,1], index: 2, kind: input, shape index: {}]   ;;  %s1108_s3 = inlined_call_operand.vmem [shape: f32[64,128], index: 3, kind: input, shape index: {}]   ;;  %s1109_s4 = inlined_call_operand.vmem [shape: f32[64,1], index: 4, kind: input, shape index: {}]   ;;  %s1110_s5 = inlined_call_operand.vmem [shape: f32[8,64], index: 5, kind: input, shape index: {}]   ;;  %s1111_s6 = inlined_call_operand.vmem [shape: f32[8,1], index: 6, kind: input, shape index: {}]   ;;  %s1112_s7 = inlined_call_operand.hbm [shape: f32[8,8], index: 7, kind: output, shape index: {}]  }
   0x1   :  { %v27_v0 = vld [vmem:[%s1105_s0] sm:$0xff]  ;;  %v28_v1 = vld [vmem:[%s1105_s0 + $0x8] sm:$0xff]  ;;  %v29_v2 = vld [vmem:[%s1105_s0 + $0x10] sm:$0xff]  ;;  %842 = vset.pattern.permute.xlu0 %v870_v6  ;;  %843 = vset.pattern.permute.xlu1 %v870_v6 }
   0x2   :  { %v785_v3 = vpack.c.bf16 %v28_v1, %v27_v0  ;;  %v30_v4 = vld [vmem:[%s1105_s0 + $0x18] sm:$0xff]  ;;  %v31_v5 = vld [vmem:[%s1106_s1] sm:$0xff]  ;;  %v49_v9 = vld [vmem:[%s1107_s2 + $0x10] sm:$0xff] }
   0x3   :  { %v789_v7 = vpack.c.bf16 %v30_v4, %v29_v2  ;;  %698 = vmatprep.mubr.msk.f32.mxu0 %vm143_vm0, %v31_v5  ;;  %v47_v8 = vld [vmem:[%s1107_s2] sm:$0xff]  ;;  %v32_v10 = vld [vmem:[%s1106_s1 + $0x8] sm:$0xff]  ;;  %75 = vperm.xlu1 %843, %v49_v9   ;;  %v33_v12 = vld [vmem:[%s1106_s1 + $0x10] sm:$0xff] }
   0x4   :  { %786 = vmatprep.subr.bf16.mxu0 %v785_v3  ;;  %65 = vperm.xlu0 %842, %v47_v8   ;;  %v48_v11 = vld [vmem:[%s1107_s2 + $0x8] sm:$0xff]  ;;  %v50_v13 = vld [vmem:[%s1107_s2 + $0x18] sm:$0xff]  ;;  %v51_v15 = vld [vmem:[%s1107_s2 + $0x20] sm:$0xff] }
   0x5   :  { %788 = vmatpush3.bf16.msra.mxu0 %v785_v3  ;;  %v34_v14 = vld [vmem:[%s1106_s1 + $0x18] sm:$0xff]  ;;  %v35_v16 = vld [vmem:[%s1106_s1 + $0x20] sm:$0xff]  ;;  %v52_v17 = vld [vmem:[%s1107_s2 + $0x28] sm:$0xff] }
   0x6   :  { %790 = vmatprep.subr.bf16.mxu0 %v789_v7 }
   0x7   :  { %80 = vperm.xlu1 %843, %v50_v13  }
   0x8   :  { %70 = vperm.xlu0 %842, %v48_v11  }
   0x9   :  { %792 = vmatpush3.bf16.msra.mxu0 %v789_v7 }
   0xc   :  { %699 = vmatmul.mubr.msk.f32.vlgmr.msra.gmra.mrb[0].mxu0 %vm143_vm0, %v32_v10  ;;  %85 = vperm.xlu0 %842, %v51_v15  }
   0xd   :  { %701 = vmatprep.mubr.msk.f32.mxu0 %vm143_vm0, %v33_v12 }
  0x10   :  { %702 = vmatmul.mubr.msk.f32.gmra.mrb[2].mxu0 %vm143_vm0, %v34_v14 }
  0x11   :  { %12 = vsyncpa [#allocation3], 0  ;;  %704 = vmatprep.mubr.msk.f32.mxu0 %vm143_vm0, %v35_v16  ;;  %v36_v18 = vld [vmem:[%s1106_s1 + $0x28] sm:$0xff]  ;;  %v53_v19 = vld [vmem:[%s1107_s2 + $0x30] sm:$0xff]  ;;  %90 = vperm.xlu1 %843, %v52_v17   ;;  %vm872_vm1 = vmmov 0   ;;  %vm529_vm2 = vcmask 523264  }
  0x12   :  { %v37_v20 = vld [vmem:[%s1106_s1 + $0x30] sm:$0xff]  ;;  %v54_v21 = vld [vmem:[%s1107_s2 + $0x38] sm:$0xff]  ;;  %95 = vperm.xlu0 %842, %v53_v19   ;;  %v55_v23 = vld [vmem:[%s1107_s2 + $0x40] sm:$0xff]  ;;  %s874_s30 = smov [#allocation2]   ;;  %vm604_vm3 = vcmask 64512  }
  0x13   :  { %v38_v22 = vld [vmem:[%s1106_s1 + $0x38] sm:$0xff]  ;;  %v39_v24 = vld [vmem:[%s1106_s1 + $0x40] sm:$0xff]  ;;  %v56_v25 = vld [vmem:[%s1107_s2 + $0x48] sm:$0xff] }
  0x14   :  { %705 = vmatmul.mubr.msk.f32.gmra.mrb[4].mxu0 %vm143_vm0, %v36_v18  ;;  %v40_v26 = vld [vmem:[%s1106_s1 + $0x48] sm:$0xff]  ;;  %v57_v27 = vld [vmem:[%s1107_s2 + $0x50] sm:$0xff]  ;;  %v58_v29 = vld [vmem:[%s1107_s2 + $0x58] sm:$0xff] }
  0x15   :  { %707 = vmatprep.mubr.msk.f32.mxu0 %vm143_vm0, %v37_v20  ;;  %100 = vperm.xlu1 %843, %v54_v21   ;;  %v41_v28 = vld [vmem:[%s1106_s1 + $0x50] sm:$0xff]  ;;  %v42_v30 = vld [vmem:[%s1106_s1 + $0x58] sm:$0xff]  ;;  %v59_v31 = vld [vmem:[%s1107_s2 + $0x60] sm:$0xff] }
  0x16   :  { %105 = vperm.xlu0 %842, %v55_v23   ;;  %v43_v32 = vld [vmem:[%s1106_s1 + $0x60] sm:$0xff]  ;;  %v60_v33 = vld [vmem:[%s1107_s2 + $0x68] sm:$0xff]  ;;  %v61_v35 = vld [vmem:[%s1107_s2 + $0x70] sm:$0xff] }
  0x17   :  { %v44_v34 = vld [vmem:[%s1106_s1 + $0x68] sm:$0xff]  ;;  %v45_v36 = vld [vmem:[%s1106_s1 + $0x70] sm:$0xff]  ;;  %v62_v37 = vld [vmem:[%s1107_s2 + $0x78] sm:$0xff] }
  0x18   :  { %708 = vmatmul.mubr.msk.f32.gmra.mrb[6].mxu0 %vm143_vm0, %v38_v22  ;;  %v46_v38 = vld [vmem:[%s1106_s1 + $0x78] sm:$0xff]  ;;  %v361_v39 = vld [vmem:[%s1109_s4] sm:$0xff]  ;;  %v362_v40 = vld [vmem:[%s1109_s4 + $0x8] sm:$0xff]  ;;  %s612_s1 = sshll.u32 %s874_s30, 4  ;;  %s613_s1 = int_to_ptr.vmem [resolvable:$true] %s612_s1 }
  0x19   :  { %710 = vmatprep.mubr.msk.f32.mxu0 %vm143_vm0, %v39_v24  ;;  %110 = vperm.xlu1 %843, %v56_v25   ;;  %v363_v41 = vld [vmem:[%s1109_s4 + $0x10] sm:$0xff]  ;;  %v364_v42 = vld [vmem:[%s1109_s4 + $0x18] sm:$0xff]  ;;  %v365_v43 = vld [vmem:[%s1109_s4 + $0x20] sm:$0xff]  ;;  %s846_s8 = scalar_lea.vmem %s613_s1, 128  ;;  %p851_p1 = scmp.lt.s32.totalorder %s613_s1, %s613_s1 }
  0x1a   :  { %115 = vperm.xlu0 %842, %v57_v27   ;;  %v366_v44 = vld [vmem:[%s1109_s4 + $0x28] sm:$0xff]  ;;  %v367_v45 = vld [vmem:[%s1109_s4 + $0x30] sm:$0xff]  ;;  %v368_v46 = vld [vmem:[%s1109_s4 + $0x38] sm:$0xff]  ;;  %p847_p0 = scmp.ne.s32.totalorder %s613_s1, %s846_s8  ;;  %p852_p2 = scmp.lt.s32.totalorder %s846_s8, %s846_s8 }
  0x1b   :  { %v523_v47 = vld [vmem:[%s1111_s6] sm:$0xff] }
  0x1c   :  { %711 = vmatmul.mubr.msk.f32.gmra.mrb[8].mxu0 %vm143_vm0, %v40_v26  ;;  %v353_v48 = vld [vmem:[%s1108_s3] sm:$0xff]  ;;  %p853_p3 = por %p852_p2, %p851_p1 }
  0x1d   :  { %713 = vmatprep.mubr.msk.f32.mxu0 %vm143_vm0, %v41_v28  ;;  %120 = vperm.xlu1 %843, %v58_v29  }
  0x1e   :  { %125 = vperm.xlu0 %842, %v59_v31   ;;  %754 = vmatprep.mubr.f32.mxu1 %v353_v48  ;;  %p854_p4 = pnand %p853_p3, %p847_p0 }
  0x20   :  { %714 = vmatmul.mubr.msk.f32.gmra.mrb[10].mxu0 %vm143_vm0, %v42_v30 }
  0x21   :  { %716 = vmatprep.mubr.msk.f32.mxu0 %vm143_vm0, %v43_v32  ;;  %130 = vperm.xlu1 %843, %v60_v33  }
  0x22   :  { %135 = vperm.xlu0 %842, %v61_v35  }
  0x24   :  { %717 = vmatmul.mubr.msk.f32.gmra.mrb[12].mxu0 %vm143_vm0, %v44_v34 }
  0x25   :  { %719 = vmatprep.mubr.msk.f32.mxu0 %vm143_vm0, %v45_v36  ;;  %140 = vperm.xlu1 %843, %v62_v37  }
  0x26   :  { %371 = vperm.xlu0 %842, %v361_v39  }
  0x28   :  { %720 = vmatmul.mubr.msk.f32.gmra.mrb[14].mxu0 %vm143_vm0, %v46_v38 }
  0x29   :  { %376 = vperm.xlu1 %843, %v362_v40  }
  0x2a   :  { %381 = vperm.xlu0 %842, %v363_v41  }
  0x2d   :  { %386 = vperm.xlu1 %843, %v364_v42  }
  0x2e   :  { %391 = vperm.xlu0 %842, %v365_v43  }
  0x31   :  { %396 = vperm.xlu1 %843, %v366_v44  }
  0x32   :  { %401 = vperm.xlu0 %842, %v367_v45  }
  0x35   :  { %406 = vperm.xlu1 %843, %v368_v46  }
  0x36   :  { %526 = vperm.xlu0 %842, %v523_v47  }
  0x82   :  { %v76_v49 = vpop.permute.xlu1 %75 }
  0x83   :  { %v66_v50 = vpop.permute.xlu0 %65 }
  0x86   :  { %v81_v51 = vpop.permute.xlu1 %80 }
  0x87   :  { %v71_v52 = vpop.permute.xlu0 %70 }
  0x8b   :  { %v86_v54 = vpop.permute.xlu0 %85 }
  0x90   :  { %v91_v53 = vpop.permute.xlu1 %90 }
  0x91   :  { %v96_v63 = vpop.permute.xlu0 %95 }
  0x94   :  { %v101_v60 = vpop.permute.xlu1 %100 }
  0x95   :  { %v106_v12 = vpop.permute.xlu0 %105 }
  0x98   :  { %v111_v9 = vpop.permute.xlu1 %110 }
  0x99   :  { %v116_v24 = vpop.permute.xlu0 %115 }
  0x9c   :  { %v121_v21 = vpop.permute.xlu1 %120 }
  0x9d   :  { %v126_v37 = vpop.permute.xlu0 %125 }
  0xa0   :  { %v131_v34 = vpop.permute.xlu1 %130 }
  0xa4   :  { %v141_v46 = vpop.permute.xlu1 %140 }
  0xdf   :  { %v700_v55 = vpop.f32.mrb[0].mxu0 }
  0xe0   :  { %v264_v56 = vadd.f32 %v700_v55, %v71_v52  ;;  %v258_v57 = vpop.f32.mrb[1].mxu0 }
  0xe1   :  { %v259_v58 = vadd.f32 %v258_v57, %v66_v50  ;;  %v354_v57 = vld [vmem:[%s1108_s3 + $0x8] sm:$0xff] }
  0xe2   :  { %v338_v59 = vmax.f32 %v264_v56, 0.0 }
  0xe3   :  { %v337_v61 = vmax.f32 %v259_v58, 0.0  ;;  %v703_v62 = vpop.f32.mrb[2].mxu0  ;;  %v355_v58 = vld [vmem:[%s1108_s3 + $0x10] sm:$0xff] }
  0xe4   :  { %v274_v0 = vadd.f32 %v703_v62, %v81_v51  ;;  %v268_v1 = vpop.f32.mrb[3].mxu0  ;;  %v359_v62 = vld [vmem:[%s1108_s3 + $0x30] sm:$0xff] }
  0xe5   :  { %v269_v2 = vadd.f32 %v268_v1, %v76_v49  ;;  %v793_v3 = vpack.c.bf16 %v338_v59, %v337_v61  ;;  %v136_v49 = vpop.permute.xlu0 %135  ;;  %v356_v59 = vld [vmem:[%s1108_s3 + $0x18] sm:$0xff]  ;;  %v358_v61 = vld [vmem:[%s1108_s3 + $0x28] sm:$0xff]  ;;  %v873_v1 = vmov 0.0  }
  0xe6   :  { %v340_v4 = vmax.f32 %v274_v0, 0.0  ;;  %v871_v0 = vmov 0.0|0.0   ;;  %782 = vmatprep.mubr.msk.f32.mxu0 %vm872_vm1, %v873_v1 }
  0xe7   :  { %v339_v5 = vmax.f32 %v269_v2, 0.0  ;;  %v706_v6 = vpop.f32.mrb[4].mxu0  ;;  %794 = vmatprep.subr.bf16.mxu1 %v793_v3  ;;  %825 = vmatprep.subr.bf16.mxu0 %v871_v0  ;;  %v377_v2 = vpop.permute.xlu1 %376 }
  0xe8   :  { %v284_v7 = vadd.f32 %v706_v6, %v91_v53  ;;  %v278_v8 = vpop.f32.mrb[5].mxu0  ;;  %796 = vmatpush3.bf16.msra.mxu1 %v793_v3 }
  0xe9   :  { %v797_v10 = vpack.c.bf16 %v340_v4, %v339_v5  ;;  %v279_v11 = vadd.f32 %v278_v8, %v86_v54  ;;  %v372_v3 = vpop.permute.xlu0 %371 }
  0xea   :  { %v342_v13 = vmax.f32 %v284_v7, 0.0 }
  0xeb   :  { %v341_v14 = vmax.f32 %v279_v11, 0.0  ;;  %v709_v15 = vpop.f32.mrb[6].mxu0  ;;  %798 = vmatprep.subr.bf16.mxu1 %v797_v10  ;;  %v387_v4 = vpop.permute.xlu1 %386 }
  0xec   :  { %v294_v16 = vadd.f32 %v709_v15, %v101_v60  ;;  %v288_v17 = vpop.f32.mrb[7].mxu0  ;;  %800 = vmatpush3.bf16.msra.mxu1 %v797_v10  ;;  %v357_v60 = vld [vmem:[%s1108_s3 + $0x20] sm:$0xff] }
  0xed   :  { %v801_v18 = vpack.c.bf16 %v342_v13, %v341_v14  ;;  %v289_v19 = vadd.f32 %v288_v17, %v96_v63  ;;  %v360_v63 = vld [vmem:[%s1108_s3 + $0x38] sm:$0xff]  ;;  %v382_v6 = vpop.permute.xlu0 %381 }
  0xee   :  { %v344_v20 = vmax.f32 %v294_v16, 0.0 }
  0xef   :  { %v343_v22 = vmax.f32 %v289_v19, 0.0  ;;  %v712_v23 = vpop.f32.mrb[8].mxu0  ;;  %802 = vmatprep.subr.bf16.mxu1 %v801_v18  ;;  %v397_v15 = vpop.permute.xlu1 %396 }
  0xf0   :  { %v304_v25 = vadd.f32 %v712_v23, %v111_v9  ;;  %v298_v26 = vpop.f32.mrb[9].mxu0  ;;  %804 = vmatpush3.bf16.msra.mxu1 %v801_v18 }
  0xf1   :  { %v805_v27 = vpack.c.bf16 %v344_v20, %v343_v22  ;;  %v299_v28 = vadd.f32 %v298_v26, %v106_v12  ;;  %v392_v18 = vpop.permute.xlu0 %391 }
  0xf2   :  { %v346_v29 = vmax.f32 %v304_v25, 0.0 }
  0xf3   :  { %v345_v30 = vmax.f32 %v299_v28, 0.0  ;;  %v715_v31 = vpop.f32.mrb[10].mxu0  ;;  %806 = vmatprep.subr.bf16.mxu1 %v805_v27 }
  0xf4   :  { %v314_v32 = vadd.f32 %v715_v31, %v121_v21  ;;  %v308_v33 = vpop.f32.mrb[11].mxu0  ;;  %808 = vmatpush3.bf16.msra.mxu1 %v805_v27  ;;  %v407_v27 = vpop.permute.xlu1 %406 }
  0xf5   :  { %v809_v35 = vpack.c.bf16 %v346_v29, %v345_v30  ;;  %v309_v36 = vadd.f32 %v308_v33, %v116_v24  ;;  %v402_v30 = vpop.permute.xlu0 %401 }
  0xf6   :  { %v348_v38 = vmax.f32 %v314_v32, 0.0 }
  0xf7   :  { %v347_v39 = vmax.f32 %v309_v36, 0.0  ;;  %v718_v40 = vpop.f32.mrb[12].mxu0  ;;  %810 = vmatprep.subr.bf16.mxu1 %v809_v35 }
  0xf8   :  { %v324_v41 = vadd.f32 %v718_v40, %v131_v34  ;;  %v318_v42 = vpop.f32.mrb[13].mxu0  ;;  %812 = vmatpush3.bf16.msra.mxu1 %v809_v35 }
  0xf9   :  { %v813_v43 = vpack.c.bf16 %v348_v38, %v347_v39  ;;  %v319_v44 = vadd.f32 %v318_v42, %v126_v37  ;;  %v522_v38 = vld [vmem:[%s1110_s5] sm:$0xff]  ;;  %v527_v39 = vpop.permute.xlu0 %526 }
  0xfa   :  { %v350_v45 = vmax.f32 %v324_v41, 0.0 }
  0xfb   :  { %v349_v47 = vmax.f32 %v319_v44, 0.0  ;;  %v721_v48 = vpop.f32.mrb[14].mxu0  ;;  %814 = vmatprep.subr.bf16.mxu1 %v813_v43 }
  0xfc   :  { %v334_v50 = vadd.f32 %v721_v48, %v141_v46  ;;  %v328_v51 = vpop.f32.mrb[15].mxu0  ;;  %816 = vmatpush3.bf16.msra.mxu1 %v813_v43 }
  0xfd   :  { %v817_v52 = vpack.c.bf16 %v350_v45, %v349_v47  ;;  %v329_v53 = vadd.f32 %v328_v51, %v136_v49 }
  0xfe   :  { %v352_v54 = vmax.f32 %v334_v50, 0.0 }
  0xff   :  { %v351_v55 = vmax.f32 %v329_v53, 0.0  ;;  %818 = vmatprep.subr.bf16.mxu1 %v817_v52 }
 0x100   :  { %820 = vmatpush3.bf16.msra.mxu1 %v817_v52 }
 0x101   :  { %v821_v56 = vpack.c.bf16 %v352_v54, %v351_v55 }
 0x103   :  { %822 = vmatprep.subr.bf16.mxu1 %v821_v56 }
 0x104   :  { %824 = vmatpush3.bf16.msra.mxu1 %v821_v56 }
 0x107   :  { %755 = vmatmul.mubr.f32.vlgmr.msra.gmra.mrb[0].mxu1 %v354_v57 }
 0x108   :  { %757 = vmatprep.mubr.f32.mxu1 %v355_v58 }
 0x10b   :  { %758 = vmatmul.mubr.f32.gmra.mrb[2].mxu1 %v356_v59 }
 0x10c   :  { %760 = vmatprep.mubr.f32.mxu1 %v357_v60 }
 0x10f   :  { %761 = vmatmul.mubr.f32.gmra.mrb[4].mxu1 %v358_v61 }
 0x110   :  { %763 = vmatprep.mubr.f32.mxu1 %v359_v62 }
 0x113   :  { %764 = vmatmul.mubr.f32.gmra.mrb[6].mxu1 %v360_v63 }
 0x1da   :  { %v756_v5 = vpop.f32.mrb[0].mxu1 }
 0x1db   :  { %v481_v7 = vadd.f32 %v756_v5, %v377_v2  ;;  %v475_v8 = vpop.f32.mrb[1].mxu1 }
 0x1dc   :  { %v476_v9 = vadd.f32 %v475_v8, %v372_v3 }
 0x1dd   :  { %v515_v10 = vmax.f32 %v481_v7, 0.0 }
 0x1de   :  { %v514_v11 = vmax.f32 %v476_v9, 0.0  ;;  %v759_v12 = vpop.f32.mrb[2].mxu1 }
 0x1df   :  { %v491_v13 = vadd.f32 %v759_v12, %v387_v4  ;;  %v485_v14 = vpop.f32.mrb[3].mxu1 }
 0x1e0   :  { %v826_v16 = vpack.c.bf16 %v515_v10, %v514_v11  ;;  %v486_v17 = vadd.f32 %v485_v14, %v382_v6 }
 0x1e1   :  { %v517_v19 = vmax.f32 %v491_v13, 0.0 }
 0x1e2   :  { %v516_v20 = vmax.f32 %v486_v17, 0.0  ;;  %v762_v21 = vpop.f32.mrb[4].mxu1  ;;  %827 = vmatpush3.bf16.msra.mxu0 %v826_v16 }
 0x1e3   :  { %v501_v22 = vadd.f32 %v762_v21, %v397_v15  ;;  %v495_v23 = vpop.f32.mrb[5].mxu1  ;;  %828 = vmatprep.subr.bf16.mxu0 %v871_v0 }
 0x1e4   :  { %v829_v24 = vpack.c.bf16 %v517_v19, %v516_v20  ;;  %v496_v25 = vadd.f32 %v495_v23, %v392_v18 }
 0x1e5   :  { %v519_v26 = vmax.f32 %v501_v22, 0.0 }
 0x1e6   :  { %v518_v28 = vmax.f32 %v496_v25, 0.0  ;;  %v765_v29 = vpop.f32.mrb[6].mxu1  ;;  %830 = vmatpush3.bf16.msra.mxu0 %v829_v24 }
 0x1e7   :  { %v511_v31 = vadd.f32 %v765_v29, %v407_v27  ;;  %v505_v32 = vpop.f32.mrb[7].mxu1  ;;  %831 = vmatprep.subr.bf16.mxu0 %v871_v0 }
 0x1e8   :  { %v832_v33 = vpack.c.bf16 %v519_v26, %v518_v28  ;;  %v506_v34 = vadd.f32 %v505_v32, %v402_v30 }
 0x1e9   :  { %v521_v35 = vmax.f32 %v511_v31, 0.0 }
 0x1ea   :  { %v520_v36 = vmax.f32 %v506_v34, 0.0  ;;  %833 = vmatpush3.bf16.msra.mxu0 %v832_v33 }
 0x1eb   :  { %834 = vmatprep.subr.bf16.mxu0 %v871_v0 }
 0x1ec   :  { %v835_v37 = vpack.c.bf16 %v521_v35, %v520_v36 }
 0x1ee   :  { %836 = vmatpush3.bf16.msra.mxu0 %v835_v37 }
 0x1f1   :  { %783 = vmatmul.mubr.msk.f32.vlgmr.msra.gmra.mrb[16].mxu0 %vm529_vm2, %v522_v38 }
 0x2c4   :  { %v599_v40 = vpop.f32.mrb[16].mxu0 }
 0x2c5   :  { %v600_v41 = vadd.f32 %v599_v40, %v527_v39  ;;  %v784_v42 = vpop.f32.mrb[17].mxu0 }
 0x2c7   :  { %844 = vtanh.f32 %v600_v41 }
 0x2d1   :  { %v845_v43 = vpop.eup %844 }
 0x2d2   :  { %605 = vst.msk [vmem:[#allocation2] sm:$0xff] %vm604_vm3, %v845_v43 }
 0x2d3   :  { %857 = shalt.err (!%p854_p4)
}
 0x2d4   :  { %s858_s10 = scalar_lea.hbm %s1112_s7, 128 }
 0x2d5   :  { %p859_p5 = scmp.ne.s32.totalorder %s1112_s7, %s858_s10  ;;  %p862_p6 = scmp.lt.u32.totalorder %s858_s10, %s1112_s7 }
 0x2d7   :  { %p864_p7 = pnand %p862_p6, %p859_p5 }
 0x2d9   :  { %867 = shalt.err (!%p864_p7)
}
 0x2da   :  { %615 = dma.vmem_to_hbm [thread:$0]  %s613_s1, 128, %s1112_s7, [#allocation3]  }
 0x2db   :  { %868 = dma.done.wait [#allocation3], 128  }
 0x2dc   :  { %869 = vsyncadd [#allocation3], 4294967168 }
 0x2dd   :  { %619 = vsyncpa [#allocation3], 1 }

</bundles_post_ra>
